<compile_context>
chip_gen: v5e
topology: v5e:2x2
jax: 0.10.0
libtpu: 0.0.40
codegen_flags: <defaults>
</compile_context>

<pallas_src>
import jax
import jax.numpy as jnp
from jax.experimental import pallas as pl
from jax.experimental.pallas import tpu as pltpu


def critic_kernel(x_ref, w1_ref, b1_ref, w2_ref, b2_ref, w3_ref, b3_ref, o_ref):
    # MXU operand dtype = weight dtype (bf16 by default, f32 in the reference
    # correctness mode).  x arrives f32 from HBM and is cast here on the VPU
    # (free, hidden under the pipeline) instead of in the wrapper.
    cdt = w1_ref.dtype
    x = x_ref[...].astype(cdt)

    # Layer 1: [Bt, k*S] @ [k*S, k*64] (block-diagonal) -> f32 acc, f32 tanh.
    h1 = jnp.tanh(
        jnp.dot(x, w1_ref[...], preferred_element_type=jnp.float32) + b1_ref[...]
    )
    # Layer 2: [Bt, k*64] @ [k*64, k*64] (block-diagonal).
    h2 = jnp.tanh(
        jnp.dot(h1.astype(cdt), w2_ref[...], preferred_element_type=jnp.float32)
        + b2_ref[...]
    )
    # Layer 3: [Bt, k*64] @ [k*64, k] (block-diagonal columns of w3).
    # Plain MXU matmul; no transposed operand, no XLU transpose of h2.
    o = (
        jnp.dot(h2.astype(cdt), w3_ref[...], preferred_element_type=jnp.float32)
        + b3_ref[...]
    )
    o_ref[...] = o.astype(o_ref.dtype)


def critic_forward(x, params, *, b_tile=4096, fold=4, compute_dtype=jnp.bfloat16):
    """x: [B, state_dim] float32 -> [B, 1] float32.

    fold:          number of batch rows folded into the lane/contraction dim
                   via block-diagonal weights (k=4 is a good default on all of
                   v5e/v6e/v7x; k=8 also works well on v6e/v7x).
    compute_dtype: MXU operand dtype (default bf16 -- bf16-native MXU on all
                   generations).  Bias adds / tanh / accumulation stay f32.
                   Pass jnp.float32 for a bit-accurate correctness mode.
    """
    w1, b1, w2, b2, w3, b3 = params
    B, S = x.shape
    H = w1.shape[1]                       # 64
    k = max(1, int(fold))
    cdt = jnp.float32 if compute_dtype is None else compute_dtype

    # Pad the batch only to a multiple of the fold factor (at most k-1 rows);
    # grid-tile remainders are handled by Pallas' partial final block.
    Bk = pl.cdiv(B, k) * k
    if Bk != B:
        x = jnp.pad(x, ((0, Bk - B), (0, 0)))
    rows, kS, kH = Bk // k, k * S, k * H

    # Free relabel (row-major layout unchanged): row i holds batch rows
    # i*k .. i*k+k-1 concatenated.
    x_f = x.reshape(rows, kS)

    # Block-diagonal weight expansion (built once per call, tiny).
    def block_diag(w):
        fi, fo = w.shape
        eye = jnp.eye(k, dtype=w.dtype)
        return (eye[:, None, :, None] * w[None, :, None, :]).reshape(k * fi, k * fo)

    w1_bd = block_diag(w1).astype(cdt)                          # [k*S,  k*H]
    w2_bd = block_diag(w2).astype(cdt)                          # [k*H,  k*H]
    w3_bd = block_diag(w3).astype(cdt)                          # [k*H,  k]
    b1_bd = jnp.tile(b1.reshape(1, H), (1, k)).astype(jnp.float32)   # [1, k*H]
    b2_bd = jnp.tile(b2.reshape(1, H), (1, k)).astype(jnp.float32)   # [1, k*H]
    b3_bd = jnp.tile(b3.reshape(1, 1), (1, k)).astype(jnp.float32)   # [1, k]

    # Folded-row tile: as big as VMEM comfortably allows, but keep >=2 grid
    # steps when possible (v7x dual TensorCore) and respect the (8,128) rule.
    def rup(a, m):
        return (a + m - 1) // m * m

    if rows <= 8:
        bt = rows                                      # single full block
    else:
        bt_cap = max(8, (b_tile // k) // 8 * 8)        # rows/step from b_tile
        # cap the double-buffered f32 x tile at ~6 MiB (safe for v5e's 16 MiB
        # scoped default and v7x's 32 MiB scoped / 64 MiB physical VMEM).
        bt_vmem = max(8, ((6 * 2 ** 20) // (2 * kS * x.dtype.itemsize)) // 8 * 8)
        bt_half = rup(pl.cdiv(rows, 2), 8)             # -> grid length >= 2
        bt = min(bt_cap, bt_vmem, bt_half)
    grid = (pl.cdiv(rows, bt),)

    def resident(shape):
        # Constant index_map -> DMA'd once, stays resident in VMEM.
        return pl.BlockSpec(shape, lambda i: (0, 0))

    out = pl.pallas_call(
        critic_kernel,
        out_shape=jax.ShapeDtypeStruct((rows, k), jnp.float32),
        grid_spec=pltpu.PrefetchScalarGridSpec(
            num_scalar_prefetch=0,
            grid=grid,
            in_specs=[
                pl.BlockSpec((bt, kS), lambda i: (i, 0)),   # x tile: pipelined
                resident((kS, kH)),                          # W1 (block-diag)
                resident((1, kH)),                           # b1
                resident((kH, kH)),                          # W2 (block-diag)
                resident((1, kH)),                           # b2
                resident((kH, k)),                           # W3 (block-diag)
                resident((1, k)),                            # b3
            ],
            out_specs=pl.BlockSpec((bt, k), lambda i: (i, 0)),
        ),
        compiler_params=pltpu.CompilerParams(
            dimension_semantics=("parallel",),
        ),
    )(x_f, w1_bd, b1_bd, w2_bd, b2_bd, w3_bd, b3_bd)

    # out[i, j] == critic(x[i*k + j]); row-major reshape restores batch order.
    return out.reshape(Bk, 1)[:B]


def init_critic_params(key, state_dim, hidden=64):
    """Deterministic init mimicking torch.nn.Linear default:
    U(-1/sqrt(fan_in), 1/sqrt(fan_in)) for both weight and bias.
    Weights stored as [in_features, out_features] so the kernel computes
    x @ W + b (equivalent to PyTorch's x @ W.T + b)."""
    def linear(key, fan_in, fan_out):
        kw, kb = jax.random.split(key)
        bound = 1.0 / jnp.sqrt(jnp.float32(fan_in))
        w = jax.random.uniform(kw, (fan_in, fan_out), jnp.float32, -bound, bound)
        b = jax.random.uniform(kb, (1, fan_out), jnp.float32, -bound, bound)
        return w, b

    k1, k2, k3 = jax.random.split(key, 3)
    w1, b1 = linear(k1, state_dim, hidden)
    w2, b2 = linear(k2, hidden, hidden)
    w3, b3 = linear(k3, hidden, 1)
    return (w1, b1, w2, b2, w3, b3)


def critic_reference(x, params):
    """Plain-JAX reference of the same forward pass."""
    w1, b1, w2, b2, w3, b3 = params
    h1 = jnp.tanh(x @ w1 + b1)
    h2 = jnp.tanh(h1 @ w2 + b2)
    return h2 @ w3 + b3


if __name__ == "__main__":
    HIDDEN = 64
    B, STATE_DIM = 8, 32

    key = jax.random.PRNGKey(0)
    kx, kp, kx2, kx3 = jax.random.split(key, 4)

    x = jax.random.normal(kx, (B, STATE_DIM), dtype=jnp.float32)
    params = init_critic_params(kp, STATE_DIM, HIDDEN)

    # --- test 1: small batch, f32 MXU operands (bit-accurate mode) ---
    out = jax.block_until_ready(critic_forward(x, params, compute_dtype=jnp.float32))
    ref = critic_reference(x, params)
    assert out.shape == (B, 1)
    assert jnp.allclose(out, ref, atol=1e-5, rtol=1e-5)

    # --- test 2: multi-block grid (B=200 -> 50 folded rows, 2 grid steps), f32 ---
    B2 = 200
    x2 = jax.random.normal(kx2, (B2, STATE_DIM), dtype=jnp.float32)
    out2 = jax.block_until_ready(critic_forward(x2, params, compute_dtype=jnp.float32))
    ref2 = critic_reference(x2, params)
    assert out2.shape == (B2, 1)
    assert jnp.allclose(out2, ref2, atol=1e-5, rtol=1e-5)

    # --- test 3: batch not a multiple of the fold factor (pad path), f32 ---
    B3 = 10
    x3 = jax.random.normal(kx3, (B3, STATE_DIM), dtype=jnp.float32)
    out3 = jax.block_until_ready(critic_forward(x3, params, compute_dtype=jnp.float32))
    ref3 = critic_reference(x3, params)
    assert out3.shape == (B3, 1)
    assert jnp.allclose(out3, ref3, atol=1e-5, rtol=1e-5)

    # --- test 4: default bf16 MXU operands (f32 bias/tanh/accumulate) ---
    out_bf16 = jax.block_until_ready(critic_forward(x2, params))
    assert out_bf16.shape == (B2, 1)
    assert jnp.allclose(out_bf16, ref2, atol=3e-2, rtol=3e-2)

    print("KERNEL_OK")
</pallas_src>

<mosaic_0001>
module attributes {stable_mosaic.version = 11 : i64} {
  func.func @critic_kernel(%arg0: i32, %arg1: memref<2x128xf32, #tpu.memory_space<vmem>>, %arg2: memref<128x256xf32, #tpu.memory_space<vmem>>, %arg3: memref<1x256xf32, #tpu.memory_space<vmem>>, %arg4: memref<256x256xf32, #tpu.memory_space<vmem>>, %arg5: memref<1x256xf32, #tpu.memory_space<vmem>>, %arg6: memref<256x4xf32, #tpu.memory_space<vmem>>, %arg7: memref<1x4xf32, #tpu.memory_space<vmem>>, %arg8: memref<2x4xf32, #tpu.memory_space<vmem>>) attributes {dimension_semantics = [#tpu.dimension_semantics<parallel>], iteration_bounds = array<i64: 1>, scalar_prefetch = 0 : i64, scratch_operands = 0 : i64, tpu.core_type = #tpu.core_type<tc>, window_params = [{transform_indices = @transform_0, window_bounds = array<i64: 2, 128>}, {pipeline_mode = #tpu.pipeline_mode<synchronous>, transform_indices = @transform_1, window_bounds = array<i64: 128, 256>}, {pipeline_mode = #tpu.pipeline_mode<synchronous>, transform_indices = @transform_2, window_bounds = array<i64: 1, 256>}, {pipeline_mode = #tpu.pipeline_mode<synchronous>, transform_indices = @transform_3, window_bounds = array<i64: 256, 256>}, {pipeline_mode = #tpu.pipeline_mode<synchronous>, transform_indices = @transform_4, window_bounds = array<i64: 1, 256>}, {pipeline_mode = #tpu.pipeline_mode<synchronous>, transform_indices = @transform_5, window_bounds = array<i64: 256, 4>}, {pipeline_mode = #tpu.pipeline_mode<synchronous>, transform_indices = @transform_6, window_bounds = array<i64: 1, 4>}, {transform_indices = @transform_7, window_bounds = array<i64: 2, 4>}]} {
    %c0 = arith.constant 0 : index
    %c0_0 = arith.constant 0 : index
    %0 = vector.load %arg1[%c0, %c0_0] : memref<2x128xf32, #tpu.memory_space<vmem>>, vector<2x128xf32>
    %c0_1 = arith.constant 0 : index
    %c0_2 = arith.constant 0 : index
    %1 = vector.load %arg2[%c0_1, %c0_2] : memref<128x256xf32, #tpu.memory_space<vmem>>, vector<128x256xf32>
    %cst = arith.constant dense<0.000000e+00> : vector<2x256xf32>
    %2 = tpu.matmul %0, %1, %cst {dimension_numbers = #tpu.dot_dimension_numbers<[1], [0], [0], [1], [0, 0, 1, 1], [], []>} : vector<2x128xf32>, vector<128x256xf32>, vector<2x256xf32> -> vector<2x256xf32>
    %c0_3 = arith.constant 0 : index
    %c0_4 = arith.constant 0 : index
    %3 = vector.load %arg3[%c0_3, %c0_4] : memref<1x256xf32, #tpu.memory_space<vmem>>, vector<1x256xf32>
    %4 = vector.broadcast %3 : vector<1x256xf32> to vector<2x256xf32>
    %5 = arith.addf %2, %4 : vector<2x256xf32>
    %6 = math.tanh %5 : vector<2x256xf32>
    %c0_5 = arith.constant 0 : index
    %c0_6 = arith.constant 0 : index
    %7 = vector.load %arg4[%c0_5, %c0_6] : memref<256x256xf32, #tpu.memory_space<vmem>>, vector<256x256xf32>
    %cst_7 = arith.constant dense<0.000000e+00> : vector<2x256xf32>
    %8 = tpu.matmul %6, %7, %cst_7 {dimension_numbers = #tpu.dot_dimension_numbers<[1], [0], [0], [1], [0, 0, 1, 1], [], []>} : vector<2x256xf32>, vector<256x256xf32>, vector<2x256xf32> -> vector<2x256xf32>
    %c0_8 = arith.constant 0 : index
    %c0_9 = arith.constant 0 : index
    %9 = vector.load %arg5[%c0_8, %c0_9] : memref<1x256xf32, #tpu.memory_space<vmem>>, vector<1x256xf32>
    %10 = vector.broadcast %9 : vector<1x256xf32> to vector<2x256xf32>
    %11 = arith.addf %8, %10 : vector<2x256xf32>
    %12 = math.tanh %11 : vector<2x256xf32>
    %c0_10 = arith.constant 0 : index
    %c0_11 = arith.constant 0 : index
    %13 = vector.load %arg6[%c0_10, %c0_11] : memref<256x4xf32, #tpu.memory_space<vmem>>, vector<256x4xf32>
    %cst_12 = arith.constant dense<0.000000e+00> : vector<2x4xf32>
    %14 = tpu.matmul %12, %13, %cst_12 {dimension_numbers = #tpu.dot_dimension_numbers<[1], [0], [0], [1], [0, 0, 1, 1], [], []>} : vector<2x256xf32>, vector<256x4xf32>, vector<2x4xf32> -> vector<2x4xf32>
    %c0_13 = arith.constant 0 : index
    %c0_14 = arith.constant 0 : index
    %15 = vector.load %arg7[%c0_13, %c0_14] : memref<1x4xf32, #tpu.memory_space<vmem>>, vector<1x4xf32>
    %16 = vector.broadcast %15 : vector<1x4xf32> to vector<2x4xf32>
    %17 = arith.addf %14, %16 : vector<2x4xf32>
    %c0_15 = arith.constant 0 : index
    %c0_16 = arith.constant 0 : index
    %18 = vector.load %arg8[%c0_15, %c0_16] : memref<2x4xf32, #tpu.memory_space<vmem>>, vector<2x4xf32>
    tpu.vector_store %arg8[%c0_15, %c0_16], %17 {strides = array<i32>} : memref<2x4xf32, #tpu.memory_space<vmem>>, vector<2x4xf32>,
    return
  }
  func.func @transform_0(%arg0: i32) -> (i32, i32) {
    %c0_i32 = arith.constant 0 : i32
    %c0_i32_0 = arith.constant 0 : i32
    return %arg0, %c0_i32 : i32, i32
  }
  func.func @transform_1(%arg0: i32) -> (i32, i32) {
    %c0_i32 = arith.constant 0 : i32
    %c0_i32_0 = arith.constant 0 : i32
    %c0_i32_1 = arith.constant 0 : i32
    return %c0_i32, %c0_i32_0 : i32, i32
  }
  func.func @transform_2(%arg0: i32) -> (i32, i32) {
    %c0_i32 = arith.constant 0 : i32
    %c0_i32_0 = arith.constant 0 : i32
    %c0_i32_1 = arith.constant 0 : i32
    return %c0_i32, %c0_i32_0 : i32, i32
  }
  func.func @transform_3(%arg0: i32) -> (i32, i32) {
    %c0_i32 = arith.constant 0 : i32
    %c0_i32_0 = arith.constant 0 : i32
    %c0_i32_1 = arith.constant 0 : i32
    return %c0_i32, %c0_i32_0 : i32, i32
  }
  func.func @transform_4(%arg0: i32) -> (i32, i32) {
    %c0_i32 = arith.constant 0 : i32
    %c0_i32_0 = arith.constant 0 : i32
    %c0_i32_1 = arith.constant 0 : i32
    return %c0_i32, %c0_i32_0 : i32, i32
  }
  func.func @transform_5(%arg0: i32) -> (i32, i32) {
    %c0_i32 = arith.constant 0 : i32
    %c0_i32_0 = arith.constant 0 : i32
    %c0_i32_1 = arith.constant 0 : i32
    return %c0_i32, %c0_i32_0 : i32, i32
  }
  func.func @transform_6(%arg0: i32) -> (i32, i32) {
    %c0_i32 = arith.constant 0 : i32
    %c0_i32_0 = arith.constant 0 : i32
    %c0_i32_1 = arith.constant 0 : i32
    return %c0_i32, %c0_i32_0 : i32, i32
  }
  func.func @transform_7(%arg0: i32) -> (i32, i32) {
    %c0_i32 = arith.constant 0 : i32
    %c0_i32_0 = arith.constant 0 : i32
    return %arg0, %c0_i32 : i32, i32
  }
}

</mosaic_0001>

<bundles_post_ra>
// kernel: tpu_custom_call.1
= control target key start
LH: loop header
LB: loop body
LE: loop exit
PB: predicated region body
PF: predicated region fallthrough
CT: control target
= control target key end

     0   :  { %12 = vsyncpa [#allocation3], 0  ;;  %s690_s0 = inlined_call_operand.vmem [shape: f32[2,128], index: 0, kind: input, shape index: {}]   ;;  %s691_s1 = inlined_call_operand.vmem [shape: f32[128,256], index: 1, kind: input, shape index: {}]   ;;  %s692_s2 = inlined_call_operand.vmem [shape: f32[1,256], index: 2, kind: input, shape index: {}]   ;;  %s693_s3 = inlined_call_operand.hbm [shape: f32[256,256], index: 3, kind: input, shape index: {}]   ;;  %s694_s4 = inlined_call_operand.vmem [shape: f32[1,256], index: 4, kind: input, shape index: {}]   ;;  %s695_s5 = inlined_call_operand.vmem [shape: f32[256,4], index: 5, kind: input, shape index: {}]   ;;  %s696_s6 = inlined_call_operand.vmem [shape: f32[1,4], index: 6, kind: input, shape index: {}]   ;;  %s697_s7 = inlined_call_operand.hbm [shape: f32[2,4], index: 7, kind: output, shape index: {}]  }
   0x1   :  { %13 = vsyncpa [#allocation4], 0  ;;  %s24_s26 = sshll.u32 %s693_s3, 4  ;;  %s436_s27 = smov [#allocation2]   ;;  %s25_s26 = int_to_ptr.hbm [resolvable:$true] %s24_s26 }
   0x2   :  { %s26_s28 = sshll.u32 %s436_s27, 4  ;;  %s437_s29 = smov 256   ;;  %s27_s28 = int_to_ptr.vmem [resolvable:$true] %s26_s28 }
   0x3   :  { %s438_s30 = smov 16  }
   0x4   :  { %32 = dma.hbm_to_vmem [thread:$0]  %s25_s26, 8192, %s27_s28, [#allocation3], %s437_s29, %s437_s29, %s438_s30  }
   0x5   :  { %432 = dma.done.wait [#allocation3], 8192  }
   0x6   :  { %433 = vsyncadd [#allocation3], 4294959104  ;;  %v74_v0 = vld [vmem:[%s691_s1 + $0xf0] sm:$0xff]  ;;  %v72_v1 = vld [vmem:[%s691_s1 + $0xe0] sm:$0xff]  ;;  %s361_s17 = sshll.u32 %s697_s7, 4  ;;  %vm352_vm0 = vcmask 25600   ;;  %s362_s17 = int_to_ptr.hbm [resolvable:$true] %s361_s17 }
   0x7   :  { %v75_v2 = vld [vmem:[%s691_s1 + $0xf8] sm:$0xff]  ;;  %82 = vmatpush.msra.mxu0 %v74_v0  ;;  %v73_v3 = vld [vmem:[%s691_s1 + $0xe8] sm:$0xff]  ;;  %v70_v4 = vld [vmem:[%s691_s1 + $0xd0] sm:$0xff] }
   0x8   :  { %102 = vmatpush.msra.mxu1 %v75_v2  ;;  %v71_v5 = vld [vmem:[%s691_s1 + $0xd8] sm:$0xff]  ;;  %v68_v6 = vld [vmem:[%s691_s1 + $0xc0] sm:$0xff]  ;;  %v69_v7 = vld [vmem:[%s691_s1 + $0xc8] sm:$0xff] }
   0x9   :  { %83 = vmatpush.msra.mxu0 %v72_v1  ;;  %v66_v8 = vld [vmem:[%s691_s1 + $0xb0] sm:$0xff]  ;;  %v67_v9 = vld [vmem:[%s691_s1 + $0xb8] sm:$0xff]  ;;  %v64_v10 = vld [vmem:[%s691_s1 + $0xa0] sm:$0xff] }
   0xa   :  { %103 = vmatpush.msra.mxu1 %v73_v3  ;;  %v65_v11 = vld [vmem:[%s691_s1 + $0xa8] sm:$0xff]  ;;  %v62_v12 = vld [vmem:[%s691_s1 + $0x90] sm:$0xff]  ;;  %v63_v13 = vld [vmem:[%s691_s1 + $0x98] sm:$0xff] }
   0xb   :  { %84 = vmatpush.msra.mxu0 %v70_v4  ;;  %v154_v14 = vld [vmem:[#allocation2 + $0xf0] sm:$0xff]  ;;  %v152_v15 = vld [vmem:[#allocation2 + $0xe0] sm:$0xff]  ;;  %v61_v17 = vld [vmem:[%s691_s1 + $0x88] sm:$0xff] }
   0xc   :  { %104 = vmatpush.msra.mxu1 %v71_v5  ;;  %v60_v16 = vld [vmem:[%s691_s1 + $0x80] sm:$0xff]  ;;  %194 = vmatpush.msra.mxu2 %v154_v14  ;;  %v186_v18 = vld [vmem:[#allocation2 + $0x1f0] sm:$0xff]  ;;  %v59_v22 = vld [vmem:[%s691_s1 + $0x78] sm:$0xff] }
   0xd   :  { %85 = vmatpush.msra.mxu0 %v68_v6  ;;  %v150_v19 = vld [vmem:[#allocation2 + $0xd0] sm:$0xff]  ;;  %v184_v20 = vld [vmem:[#allocation2 + $0x1e0] sm:$0xff]  ;;  %214 = vmatpush.msra.mxu3 %v186_v18  ;;  %v57_v26 = vld [vmem:[%s691_s1 + $0x68] sm:$0xff] }
   0xe   :  { %105 = vmatpush.msra.mxu1 %v69_v7  ;;  %v58_v21 = vld [vmem:[%s691_s1 + $0x70] sm:$0xff]  ;;  %195 = vmatpush.msra.mxu2 %v152_v15  ;;  %v148_v23 = vld [vmem:[#allocation2 + $0xc0] sm:$0xff]  ;;  %v55_v30 = vld [vmem:[%s691_s1 + $0x58] sm:$0xff] }
   0xf   :  { %86 = vmatpush.msra.mxu0 %v66_v8  ;;  %v182_v24 = vld [vmem:[#allocation2 + $0x1d0] sm:$0xff]  ;;  %v56_v25 = vld [vmem:[%s691_s1 + $0x60] sm:$0xff]  ;;  %215 = vmatpush.msra.mxu3 %v184_v20  ;;  %v53_v34 = vld [vmem:[%s691_s1 + $0x48] sm:$0xff] }
  0x10   :  { %106 = vmatpush.msra.mxu1 %v67_v9  ;;  %196 = vmatpush.msra.mxu2 %v150_v19  ;;  %v146_v27 = vld [vmem:[#allocation2 + $0xb0] sm:$0xff]  ;;  %v180_v28 = vld [vmem:[#allocation2 + $0x1c0] sm:$0xff]  ;;  %v51_v38 = vld [vmem:[%s691_s1 + $0x38] sm:$0xff] }
  0x11   :  { %87 = vmatpush.msra.mxu0 %v64_v10  ;;  %v54_v29 = vld [vmem:[%s691_s1 + $0x50] sm:$0xff]  ;;  %216 = vmatpush.msra.mxu3 %v182_v24  ;;  %v144_v31 = vld [vmem:[#allocation2 + $0xa0] sm:$0xff]  ;;  %v49_v42 = vld [vmem:[%s691_s1 + $0x28] sm:$0xff] }
  0x12   :  { %107 = vmatpush.msra.mxu1 %v65_v11  ;;  %197 = vmatpush.msra.mxu2 %v148_v23  ;;  %v178_v32 = vld [vmem:[#allocation2 + $0x1b0] sm:$0xff]  ;;  %v52_v33 = vld [vmem:[%s691_s1 + $0x40] sm:$0xff]  ;;  %v47_v46 = vld [vmem:[%s691_s1 + $0x18] sm:$0xff] }
  0x13   :  { %88 = vmatpush.msra.mxu0 %v62_v12  ;;  %217 = vmatpush.msra.mxu3 %v180_v28  ;;  %v142_v35 = vld [vmem:[#allocation2 + $0x90] sm:$0xff]  ;;  %v176_v36 = vld [vmem:[#allocation2 + $0x1a0] sm:$0xff]  ;;  %v45_v50 = vld [vmem:[%s691_s1 + $0x8] sm:$0xff] }
  0x14   :  { %108 = vmatpush.msra.mxu1 %v63_v13  ;;  %198 = vmatpush.msra.mxu2 %v146_v27  ;;  %v50_v37 = vld [vmem:[%s691_s1 + $0x30] sm:$0xff]  ;;  %v140_v39 = vld [vmem:[#allocation2 + $0x80] sm:$0xff]  ;;  %v155_v52 = vld [vmem:[#allocation2 + $0xf8] sm:$0xff] }
  0x15   :  { %89 = vmatpush.msra.mxu0 %v60_v16  ;;  %218 = vmatpush.msra.mxu3 %v178_v32  ;;  %v174_v40 = vld [vmem:[#allocation2 + $0x190] sm:$0xff]  ;;  %v48_v41 = vld [vmem:[%s691_s1 + $0x20] sm:$0xff]  ;;  %v187_v53 = vld [vmem:[#allocation2 + $0x1f8] sm:$0xff] }
  0x16   :  { %109 = vmatpush.msra.mxu1 %v61_v17  ;;  %199 = vmatpush.msra.mxu2 %v144_v31  ;;  %v138_v43 = vld [vmem:[#allocation2 + $0x70] sm:$0xff]  ;;  %v172_v44 = vld [vmem:[#allocation2 + $0x180] sm:$0xff]  ;;  %v153_v56 = vld [vmem:[#allocation2 + $0xe8] sm:$0xff] }
  0x17   :  { %90 = vmatpush.msra.mxu0 %v58_v21  ;;  %219 = vmatpush.msra.mxu3 %v176_v36  ;;  %v46_v45 = vld [vmem:[%s691_s1 + $0x10] sm:$0xff]  ;;  %v136_v47 = vld [vmem:[#allocation2 + $0x60] sm:$0xff]  ;;  %v185_v57 = vld [vmem:[#allocation2 + $0x1e8] sm:$0xff] }
  0x18   :  { %110 = vmatpush.msra.mxu1 %v59_v22  ;;  %200 = vmatpush.msra.mxu2 %v142_v35  ;;  %v170_v48 = vld [vmem:[#allocation2 + $0x170] sm:$0xff]  ;;  %v44_v49 = vld [vmem:[%s691_s1] sm:$0xff]  ;;  %v151_v58 = vld [vmem:[#allocation2 + $0xd8] sm:$0xff] }
  0x19   :  { %91 = vmatpush.msra.mxu0 %v56_v25  ;;  %220 = vmatpush.msra.mxu3 %v174_v40  ;;  %v43_v51 = vld [vmem:[%s690_s0] sm:$0x3]  ;;  %v134_v54 = vld [vmem:[#allocation2 + $0x50] sm:$0xff]  ;;  %v183_v59 = vld [vmem:[#allocation2 + $0x1d8] sm:$0xff] }
  0x1a   :  { %111 = vmatpush.msra.mxu1 %v57_v26  ;;  %201 = vmatpush.msra.mxu2 %v140_v39  ;;  %v168_v55 = vld [vmem:[#allocation2 + $0x160] sm:$0xff]  ;;  %v149_v60 = vld [vmem:[#allocation2 + $0xc8] sm:$0xff]  ;;  %v147_v62 = vld [vmem:[#allocation2 + $0xb8] sm:$0xff] }
  0x1b   :  { %92 = vmatpush.msra.mxu0 %v54_v29  ;;  %221 = vmatpush.msra.mxu3 %v172_v44  ;;  %v181_v61 = vld [vmem:[#allocation2 + $0x1c8] sm:$0xff]  ;;  %v179_v63 = vld [vmem:[#allocation2 + $0x1b8] sm:$0xff]  ;;  %v132_v11 = vld [vmem:[#allocation2 + $0x40] sm:$0xff] }
  0x1c   :  { %112 = vmatpush.msra.mxu1 %v55_v30  ;;  %202 = vmatpush.msra.mxu2 %v138_v43  ;;  %v145_v0 = vld [vmem:[#allocation2 + $0xa8] sm:$0xff]  ;;  %v143_v2 = vld [vmem:[#allocation2 + $0x98] sm:$0xff]  ;;  %v166_v12 = vld [vmem:[#allocation2 + $0x150] sm:$0xff] }
  0x1d   :  { %93 = vmatpush.msra.mxu0 %v52_v33  ;;  %222 = vmatpush.msra.mxu3 %v170_v48  ;;  %v177_v1 = vld [vmem:[#allocation2 + $0x1a8] sm:$0xff]  ;;  %v175_v3 = vld [vmem:[#allocation2 + $0x198] sm:$0xff]  ;;  %v130_v15 = vld [vmem:[#allocation2 + $0x30] sm:$0xff] }
  0x1e   :  { %113 = vmatpush.msra.mxu1 %v53_v34  ;;  %203 = vmatpush.msra.mxu2 %v136_v47  ;;  %v141_v4 = vld [vmem:[#allocation2 + $0x88] sm:$0xff]  ;;  %v139_v6 = vld [vmem:[#allocation2 + $0x78] sm:$0xff]  ;;  %v164_v16 = vld [vmem:[#allocation2 + $0x140] sm:$0xff] }
  0x1f   :  { %94 = vmatpush.msra.mxu0 %v50_v37  ;;  %223 = vmatpush.msra.mxu3 %v168_v55  ;;  %v173_v5 = vld [vmem:[#allocation2 + $0x188] sm:$0xff]  ;;  %v171_v7 = vld [vmem:[#allocation2 + $0x178] sm:$0xff]  ;;  %v128_v19 = vld [vmem:[#allocation2 + $0x20] sm:$0xff] }
  0x20   :  { %114 = vmatpush.msra.mxu1 %v51_v38  ;;  %204 = vmatpush.msra.mxu2 %v134_v54  ;;  %v137_v8 = vld [vmem:[#allocation2 + $0x68] sm:$0xff]  ;;  %v135_v10 = vld [vmem:[#allocation2 + $0x58] sm:$0xff]  ;;  %v162_v20 = vld [vmem:[#allocation2 + $0x130] sm:$0xff] }
  0x21   :  { %95 = vmatpush.msra.mxu0 %v48_v41  ;;  %v169_v9 = vld [vmem:[#allocation2 + $0x168] sm:$0xff]  ;;  %224 = vmatpush.msra.mxu3 %v166_v12  ;;  %v167_v14 = vld [vmem:[#allocation2 + $0x158] sm:$0xff]  ;;  %v126_v23 = vld [vmem:[#allocation2 + $0x10] sm:$0xff] }
  0x22   :  { %115 = vmatpush.msra.mxu1 %v49_v42  ;;  %v133_v13 = vld [vmem:[#allocation2 + $0x48] sm:$0xff]  ;;  %205 = vmatpush.msra.mxu2 %v132_v11  ;;  %v131_v17 = vld [vmem:[#allocation2 + $0x38] sm:$0xff]  ;;  %v160_v24 = vld [vmem:[#allocation2 + $0x120] sm:$0xff] }
  0x23   :  { %96 = vmatpush.msra.mxu0 %v46_v45  ;;  %225 = vmatpush.msra.mxu3 %v164_v16  ;;  %v165_v18 = vld [vmem:[#allocation2 + $0x148] sm:$0xff]  ;;  %v163_v22 = vld [vmem:[#allocation2 + $0x138] sm:$0xff]  ;;  %v124_v27 = vld [vmem:[#allocation2] sm:$0xff] }
  0x24   :  { %116 = vmatpush.msra.mxu1 %v47_v46  ;;  %206 = vmatpush.msra.mxu2 %v130_v15  ;;  %v129_v21 = vld [vmem:[#allocation2 + $0x28] sm:$0xff]  ;;  %v127_v25 = vld [vmem:[#allocation2 + $0x18] sm:$0xff]  ;;  %v158_v28 = vld [vmem:[#allocation2 + $0x110] sm:$0xff] }
  0x25   :  { %97 = vmatpush.msra.mxu0 %v44_v49  ;;  %226 = vmatpush.msra.mxu3 %v162_v20  ;;  %v161_v26 = vld [vmem:[#allocation2 + $0x128] sm:$0xff]  ;;  %v159_v30 = vld [vmem:[#allocation2 + $0x118] sm:$0xff]  ;;  %v156_v31 = vld [vmem:[#allocation2 + $0x100] sm:$0xff] }
  0x26   :  { %117 = vmatpush.msra.mxu1 %v45_v50  ;;  %98 = vmatmul.f32.vlgmr.msra.gmra.mxu0 %v43_v51  ;;  %v125_v29 = vld [vmem:[#allocation2 + $0x8] sm:$0xff]  ;;  %v307_v33 = vld [vmem:[%s695_s5 + $0xf8] sm:$0xff]  ;;  %v306_v34 = vld [vmem:[%s695_s5 + $0xf0] sm:$0xff] }
  0x27   :  { %118 = vmatmul.f32.vlgmr.msra.gmra.mxu1 %v43_v51  ;;  %234 = vmatpush.msrb.mxu0 %v155_v52  ;;  %v157_v32 = vld [vmem:[#allocation2 + $0x108] sm:$0xff]  ;;  %v291_v35 = vld [vmem:[%s695_s5 + $0x78] sm:$0xff]  ;;  %v290_v36 = vld [vmem:[%s695_s5 + $0x70] sm:$0xff] }
  0x28   :  { %254 = vmatpush.msrb.mxu1 %v187_v53  ;;  %207 = vmatpush.msra.mxu2 %v128_v19  ;;  %v305_v37 = vld [vmem:[%s695_s5 + $0xe8] sm:$0xff]  ;;  %v304_v39 = vld [vmem:[%s695_s5 + $0xe0] sm:$0xff]  ;;  %v303_v41 = vld [vmem:[%s695_s5 + $0xd8] sm:$0xff] }
  0x29   :  { %235 = vmatpush.msrb.mxu0 %v153_v56  ;;  %227 = vmatpush.msra.mxu3 %v160_v24  ;;  %v289_v38 = vld [vmem:[%s695_s5 + $0x68] sm:$0xff]  ;;  %v288_v40 = vld [vmem:[%s695_s5 + $0x60] sm:$0xff]  ;;  %v287_v42 = vld [vmem:[%s695_s5 + $0x58] sm:$0xff] }
  0x2a   :  { %255 = vmatpush.msrb.mxu1 %v185_v57  ;;  %208 = vmatpush.msra.mxu2 %v126_v23  ;;  %v302_v43 = vld [vmem:[%s695_s5 + $0xd0] sm:$0xff]  ;;  %v301_v45 = vld [vmem:[%s695_s5 + $0xc8] sm:$0xff]  ;;  %v300_v47 = vld [vmem:[%s695_s5 + $0xc0] sm:$0xff] }
  0x2b   :  { %236 = vmatpush.msrb.mxu0 %v151_v58  ;;  %228 = vmatpush.msra.mxu3 %v158_v28  ;;  %v286_v44 = vld [vmem:[%s695_s5 + $0x50] sm:$0xff]  ;;  %v285_v46 = vld [vmem:[%s695_s5 + $0x48] sm:$0xff]  ;;  %v299_v48 = vld [vmem:[%s695_s5 + $0xb8] sm:$0xff] }
  0x2c   :  { %256 = vmatpush.msrb.mxu1 %v183_v59  ;;  %209 = vmatpush.msra.mxu2 %v124_v27  ;;  %v76_v49 = vld [vmem:[%s692_s2] sm:$0x3]  ;;  %v298_v50 = vld [vmem:[%s695_s5 + $0xb0] sm:$0xff] }
  0x2d   :  { %237 = vmatpush.msrb.mxu0 %v149_v60  ;;  %229 = vmatpush.msra.mxu3 %v156_v31  ;;  %v78_v51 = vperm.slane %v76_v49, 0  ;;  %v79_v52 = vperm.slane %v76_v49, 1  ;;  %v284_v59 = vld [vmem:[%s695_s5 + $0x40] sm:$0xff]  ;;  %v297_v60 = vld [vmem:[%s695_s5 + $0xa8] sm:$0xff] }
  0x2e   :  { %257 = vmatpush.msrb.mxu1 %v181_v61  ;;  %312 = vmatpush.msrb.mxu2 %v291_v35  ;;  %v283_v61 = vld [vmem:[%s695_s5 + $0x38] sm:$0xff]  ;;  %v375_v23 = vld [vmem:[%s696_s6] ss:$0 sm:$0xff] }
  0x2f   :  { %238 = vmatpush.msrb.mxu0 %v147_v62  ;;  %332 = vmatpush.msrb.mxu3 %v307_v33  ;;  %v296_v62 = vld [vmem:[%s695_s5 + $0xa0] sm:$0xff] }
  0x30   :  { %258 = vmatpush.msrb.mxu1 %v179_v63  ;;  %313 = vmatpush.msrb.mxu2 %v290_v36  ;;  %v282_v63 = vld [vmem:[%s695_s5 + $0x30] sm:$0xff] }
  0x31   :  { %239 = vmatpush.msrb.mxu0 %v145_v0  ;;  %333 = vmatpush.msrb.mxu3 %v306_v34  ;;  %v295_v0 = vld [vmem:[%s695_s5 + $0x98] sm:$0xff] }
  0x32   :  { %259 = vmatpush.msrb.mxu1 %v177_v1  ;;  %314 = vmatpush.msrb.mxu2 %v289_v38  ;;  %v281_v1 = vld [vmem:[%s695_s5 + $0x28] sm:$0xff] }
  0x33   :  { %240 = vmatpush.msrb.mxu0 %v143_v2  ;;  %334 = vmatpush.msrb.mxu3 %v305_v37  ;;  %v294_v2 = vld [vmem:[%s695_s5 + $0x90] sm:$0xff] }
  0x34   :  { %260 = vmatpush.msrb.mxu1 %v175_v3  ;;  %315 = vmatpush.msrb.mxu2 %v288_v40  ;;  %v280_v3 = vld [vmem:[%s695_s5 + $0x20] sm:$0xff] }
  0x35   :  { %241 = vmatpush.msrb.mxu0 %v141_v4  ;;  %335 = vmatpush.msrb.mxu3 %v304_v39  ;;  %v293_v4 = vld [vmem:[%s695_s5 + $0x88] sm:$0xff] }
  0x36   :  { %261 = vmatpush.msrb.mxu1 %v173_v5  ;;  %316 = vmatpush.msrb.mxu2 %v287_v42  ;;  %v279_v5 = vld [vmem:[%s695_s5 + $0x18] sm:$0xff] }
  0x37   :  { %242 = vmatpush.msrb.mxu0 %v139_v6  ;;  %336 = vmatpush.msrb.mxu3 %v303_v41  ;;  %v292_v6 = vld [vmem:[%s695_s5 + $0x80] sm:$0xff] }
  0x38   :  { %262 = vmatpush.msrb.mxu1 %v171_v7  ;;  %317 = vmatpush.msrb.mxu2 %v286_v44  ;;  %v278_v7 = vld [vmem:[%s695_s5 + $0x10] sm:$0xff] }
  0x39   :  { %243 = vmatpush.msrb.mxu0 %v137_v8  ;;  %337 = vmatpush.msrb.mxu3 %v302_v43  ;;  %v277_v8 = vld [vmem:[%s695_s5 + $0x8] sm:$0xff] }
  0x3a   :  { %263 = vmatpush.msrb.mxu1 %v169_v9  ;;  %318 = vmatpush.msrb.mxu2 %v285_v46  ;;  %v276_v9 = vld [vmem:[%s695_s5] sm:$0xff] }
  0x3b   :  { %244 = vmatpush.msrb.mxu0 %v135_v10  ;;  %338 = vmatpush.msrb.mxu3 %v301_v45  ;;  %v188_v10 = vld [vmem:[%s694_s4] sm:$0x3]  ;;  %s439_s4 = smov [#allocation5]  }
  0x3c   :  { %264 = vmatpush.msrb.mxu1 %v167_v14  ;;  %319 = vmatpush.msrb.mxu2 %v284_v59  ;;  %v191_v11 = vperm.slane %v188_v10, 1  ;;  %v190_v16 = vperm.slane %v188_v10, 0  ;;  %s359_s14 = sshll.u32 %s439_s4, 4  ;;  %s360_s14 = int_to_ptr.vmem [resolvable:$true] %s359_s14 }
  0x3d   :  { %245 = vmatpush.msrb.mxu0 %v133_v13  ;;  %339 = vmatpush.msrb.mxu3 %v300_v47 }
  0x3e   :  { %265 = vmatpush.msrb.mxu1 %v165_v18  ;;  %320 = vmatpush.msrb.mxu2 %v283_v61 }
  0x3f   :  { %246 = vmatpush.msrb.mxu0 %v131_v17  ;;  %340 = vmatpush.msrb.mxu3 %v299_v48 }
  0x40   :  { %266 = vmatpush.msrb.mxu1 %v163_v22  ;;  %321 = vmatpush.msrb.mxu2 %v282_v63 }
  0x41   :  { %247 = vmatpush.msrb.mxu0 %v129_v21  ;;  %341 = vmatpush.msrb.mxu3 %v298_v50 }
  0x42   :  { %267 = vmatpush.msrb.mxu1 %v161_v26  ;;  %322 = vmatpush.msrb.mxu2 %v281_v1 }
  0x43   :  { %248 = vmatpush.msrb.mxu0 %v127_v25  ;;  %342 = vmatpush.msrb.mxu3 %v297_v60 }
  0x44   :  { %268 = vmatpush.msrb.mxu1 %v159_v30  ;;  %323 = vmatpush.msrb.mxu2 %v280_v3 }
  0x45   :  { %249 = vmatpush.msrb.mxu0 %v125_v29  ;;  %343 = vmatpush.msrb.mxu3 %v296_v62 }
  0x46   :  { %269 = vmatpush.msrb.mxu1 %v157_v32  ;;  %324 = vmatpush.msrb.mxu2 %v279_v5 }
  0x47   :  { %344 = vmatpush.msrb.mxu3 %v295_v0 }
  0x48   :  { %325 = vmatpush.msrb.mxu2 %v278_v7 }
  0x49   :  { %345 = vmatpush.msrb.mxu3 %v294_v2 }
  0x4a   :  { %326 = vmatpush.msrb.mxu2 %v277_v8 }
  0x4b   :  { %346 = vmatpush.msrb.mxu3 %v293_v4 }
  0x4c   :  { %327 = vmatpush.msrb.mxu2 %v276_v9 }
  0x4d   :  { %347 = vmatpush.msrb.mxu3 %v292_v6 }
  0xa3   :  { %v99_v53 = vpop.f32.mrf.mxu0 }
  0xa4   :  { %v119_v54 = vpop.f32.mrf.mxu1  ;;  %v100_v55 = vadd.f32 %v99_v53, %v78_v51 }
  0xa5   :  { %v120_v56 = vadd.f32 %v119_v54, %v79_v52 }
  0xa6   :  { %376 = vtanh.f32 %v100_v55 }
  0xa7   :  { %378 = vtanh.f32 %v120_v56 }
  0xac   :  { %v377_v57 = vpop.eup %376 }
  0xad   :  { %v379_v58 = vpop.eup %378  ;;  %210 = vmatmul.f32.vlgmr.msra.gmra.mxu2 %v377_v57  ;;  %250 = vmatmul.f32.vlgmr.msrb.gmra.mxu0 %v377_v57 }
  0xae   :  { %230 = vmatmul.f32.vlgmr.msra.gmra.mxu3 %v379_v58  ;;  %270 = vmatmul.f32.vlgmr.msrb.gmra.mxu1 %v379_v58 }
 0x12a   :  { %v251_v12 = vpop.f32.mrf.mxu0 }
 0x12b   :  { %v252_v13 = vadd.f32 %v251_v12, %v191_v11  ;;  %v271_v14 = vpop.f32.mrf.mxu1 }
 0x12d   :  { %v272_v15 = vadd.f32 %v271_v14, %v252_v13 }
 0x12f   :  { %380 = vtanh.f32 %v272_v15 }
 0x130   :  { %v211_v17 = vpop.f32.mrf.mxu2 }
 0x131   :  { %v212_v18 = vadd.f32 %v211_v17, %v190_v16  ;;  %v231_v19 = vpop.f32.mrf.mxu3 }
 0x133   :  { %v232_v20 = vadd.f32 %v231_v19, %v212_v18 }
 0x135   :  { %v381_v21 = vpop.eup %380  ;;  %382 = vtanh.f32 %v232_v20 }
 0x136   :  { %348 = vmatmul.f32.vlgmr.msrb.gmra.mxu3 %v381_v21 }
 0x13b   :  { %v383_v22 = vpop.eup %382 }
 0x13c   :  { %328 = vmatmul.f32.vlgmr.msrb.gmra.mxu2 %v383_v22 }
 0x1b9   :  { %v349_v26 = vpop.f32.mrf.mxu3 }
 0x1bf   :  { %v329_v24 = vpop.f32.mrf.mxu2 }
 0x1c0   :  { %v330_v25 = vadd.f32 %v375_v23, %v329_v24 }
 0x1c2   :  { %v350_v27 = vadd.f32 %v349_v26, %v330_v25 }
 0x1c4   :  { %353 = vst.msk [vmem:[#allocation5] sm:$0x3] %vm352_vm0, %v350_v27 }
 0x1c5   :  { %364 = dma.vmem_to_hbm [thread:$0]  %s360_s14, 32, %s362_s17, [#allocation4]  }
 0x1c6   :  { %434 = dma.done.wait [#allocation4], 32  }
 0x1c7   :  { %435 = vsyncadd [#allocation4], 4294967264 }
 0x1c8   :  { %369 = vsyncpa [#allocation3], 1 }
 0x1c9   :  { %370 = vsyncpa [#allocation4], 1 }

</bundles_post_ra>
